<compile_context>
chip_gen: v7x
topology: tpu7x:2x2x1
jax: 0.10.0
libtpu: 0.0.40
codegen_flags: <defaults>
</compile_context>

<pallas_src>
import jax
import jax.numpy as jnp
from jax.experimental import pallas as pl
from jax.experimental.pallas import tpu as pltpu

# input -> hidden -> 50 -> 20 -> 5 -> num_classes  (matches the PyTorch module)
LAYER_SIZES = (6, 10, 50, 20, 5, 1)
_N_LAYERS = len(LAYER_SIZES) - 1

_LANE = 128
_SUBLANE = 8
_TB_MAX = 4096  # batch tile (lane axis); per-step VMEM stays well under 4 MB


def _round_up(x, m):
    return ((x + m - 1) // m) * m


def _cdiv(a, b):
    return (a + b - 1) // b


# Padded heights of the *augmented* activations (real rows + 1 ones row, 8-aligned)
_H_IN = tuple(_round_up(s + 1, _SUBLANE) for s in LAYER_SIZES[:-1])          # (8,16,56,24,8)
# Padded heights of each layer's augmented output (last layer needs no ones row)
_H_OUT = tuple(_round_up(s + 1, _SUBLANE) for s in LAYER_SIZES[1:-1]) + (
    _round_up(LAYER_SIZES[-1], _SUBLANE),)                                   # (16,56,24,8,8)

_ROW_OFFS = []
_off = 0
for _h in _H_OUT:
    _ROW_OFFS.append(_off)
    _off += _h
_ROW_OFFS = tuple(_ROW_OFFS)   # (0, 16, 72, 96, 104)
_SLAB_ROWS = _off              # 112


def pack_params(params):
    """Pack [(W(out,in), b(out,)), ...] (PyTorch nn.Linear layout) into one
    (112, 128) f32 slab of augmented, zero-padded weight blocks.

    Layer k occupies rows [off_k, off_k + H_OUT[k]):
      [0:out, 0:in]  = W_k
      [0:out, in]    = b_k                (bias column, consumed by the ones row of h)
      [out,   in]    = 1.0                (propagates the ones row; skipped for last layer)
      everything else = 0                 (padded rows/cols contribute nothing)
    """
    slab = jnp.zeros((_SLAB_ROWS, _LANE), jnp.float32)
    for k, (w, b) in enumerate(params):
        in_k, out_k = LAYER_SIZES[k], LAYER_SIZES[k + 1]
        off = _ROW_OFFS[k]
        slab = slab.at[off:off + out_k, 0:in_k].set(w.astype(jnp.float32))
        slab = slab.at[off:off + out_k, in_k].set(b.astype(jnp.float32))
        if k < _N_LAYERS - 1:
            slab = slab.at[off + out_k, in_k].set(1.0)
    return slab


def _mlp_kernel(w_ref, x_ref, o_ref):
    # w_ref: (112, 128) packed augmented params, resident across grid steps
    # x_ref: (8, TB)  -- rows 0..5 = x.T, row 6 = ones, row 7 = zeros (lane-dense)
    # o_ref: (1, TB)  -- lane-dense output
    h = x_ref[...]
    for k in range(_N_LAYERS):
        off = _ROW_OFFS[k]
        # 8-aligned sublane window, lane window starting at 0 -> no relayout copies.
        w = w_ref[off:off + _H_OUT[k], 0:_H_IN[k]]
        # Bias + ones-row propagation are folded into the matmul (MXU has huge slack).
        h = jnp.dot(w, h, preferred_element_type=jnp.float32)
        if k < _N_LAYERS - 1:
            h = jnp.maximum(h, 0.0)
    o_ref[...] = h[0:LAYER_SIZES[-1], :].astype(o_ref.dtype)


@jax.jit
def neural_net_forward(x, slab):
    """x: (batch, input_size) f32. slab: output of pack_params. Returns (batch, 1)."""
    batch = x.shape[0]
    in_size = LAYER_SIZES[0]
    num_classes = LAYER_SIZES[-1]

    # Lane-aligned padded batch; prefer >= 2 tiles so both TCs on v7x get work,
    # otherwise take the largest tile (fewer grid steps = less fixed overhead).
    b_pad = _round_up(max(batch, _LANE), _LANE)
    tb = min(_TB_MAX, max(_LANE, _round_up(_cdiv(b_pad, 2), _LANE)))
    b_pad = _round_up(b_pad, tb)
    grid = (b_pad // tb,)

    # Layout plumbing: batch on the lane axis; append the constant ones row (bias
    # folding) and zero pad rows so the kernel input block is a full (8, tb) tile.
    xt = jnp.transpose(x.astype(jnp.float32))              # (6, batch)
    xt = jnp.pad(xt, ((0, 0), (0, b_pad - batch)))         # (6, b_pad)
    pieces = [xt, jnp.ones((1, b_pad), jnp.float32)]
    pad_rows = _H_IN[0] - in_size - 1
    if pad_rows:
        pieces.append(jnp.zeros((pad_rows, b_pad), jnp.float32))
    x_aug = jnp.concatenate(pieces, axis=0)                 # (8, b_pad)

    out_t = pl.pallas_call(
        _mlp_kernel,
        out_shape=jax.ShapeDtypeStruct((num_classes, b_pad), jnp.float32),
        grid=grid,
        in_specs=[
            pl.BlockSpec((_SLAB_ROWS, _LANE), lambda i: (0, 0)),  # weights stay resident
            pl.BlockSpec((_H_IN[0], tb), lambda i: (0, i)),
        ],
        out_specs=pl.BlockSpec((num_classes, tb), lambda i: (0, i)),
        compiler_params=pltpu.CompilerParams(
            dimension_semantics=("parallel",),      # shards batch tiles across TCs on v7x
            vmem_limit_bytes=32 * 1024 * 1024,      # explicit headroom (v5e default ~16 MiB)
            allow_input_fusion=[False, True],       # let XLA fuse the x transpose/pad/concat
        ),
    )(slab, x_aug)

    return jnp.transpose(out_t[:, :batch])                  # (batch, num_classes)


def init_params(key):
    """PyTorch-layout init mimicking nn.Linear: W (out,in), b (out,),
    uniform(-1/sqrt(fan_in), 1/sqrt(fan_in))."""
    params = []
    for in_k, out_k in zip(LAYER_SIZES[:-1], LAYER_SIZES[1:]):
        key, kw, kb = jax.random.split(key, 3)
        bound = 1.0 / jnp.sqrt(jnp.float32(in_k))
        w = jax.random.uniform(kw, (out_k, in_k), jnp.float32, -bound, bound)
        b = jax.random.uniform(kb, (out_k,), jnp.float32, -bound, bound)
        params.append((w, b))
    return params


def reference_forward(x, params):
    h = x
    for i, (w, b) in enumerate(params):
        h = h @ w.T + b
        if i < len(params) - 1:
            h = jnp.maximum(h, 0.0)
    return h


if __name__ == "__main__":
    key = jax.random.PRNGKey(0)
    key, kx1, kx2 = jax.random.split(key, 3)

    params = init_params(key)
    slab = pack_params(params)

    # batch=300: not a tile multiple -> exercises padding and a 2-step grid.
    # batch=4:   tiny batch path (single 128-lane tile).
    for batch, kx in ((300, kx1), (4, kx2)):
        x = jax.random.normal(kx, (batch, LAYER_SIZES[0]), jnp.float32)
        out = jax.block_until_ready(neural_net_forward(x, slab))
        ref = reference_forward(x, params)
        assert out.shape == (batch, LAYER_SIZES[-1])
        assert jnp.allclose(out, ref, atol=5e-5, rtol=5e-5), f"mismatch at batch={batch}"

    print("KERNEL_OK")
</pallas_src>

<mosaic_0001>
module attributes {stable_mosaic.version = 11 : i64} {
  func.func @_mlp_kernel(%arg0: i32, %arg1: memref<112x128xf32, #tpu.memory_space<vmem>>, %arg2: memref<8x256xf32, #tpu.memory_space<vmem>>, %arg3: memref<1x256xf32, #tpu.memory_space<vmem>>) attributes {dimension_semantics = [#tpu.dimension_semantics<parallel>], iteration_bounds = array<i64: 2>, scalar_prefetch = 0 : i64, scratch_operands = 0 : i64, tpu.core_type = #tpu.core_type<tc>, window_params = [{pipeline_mode = #tpu.pipeline_mode<synchronous>, transform_indices = @transform_0, window_bounds = array<i64: 112, 128>}, {transform_indices = @transform_1, window_bounds = array<i64: 8, 256>}, {transform_indices = @transform_2, window_bounds = array<i64: 1, 256>}]} {
    %c0 = arith.constant 0 : index
    %c0_0 = arith.constant 0 : index
    %0 = vector.load %arg2[%c0, %c0_0] : memref<8x256xf32, #tpu.memory_space<vmem>>, vector<8x256xf32>
    %c0_1 = arith.constant 0 : index
    %c0_2 = arith.constant 0 : index
    %1 = vector.load %arg1[%c0_1, %c0_2] : memref<112x128xf32, #tpu.memory_space<vmem>>, vector<16x8xf32>
    %cst = arith.constant dense<0.000000e+00> : vector<16x256xf32>
    %2 = tpu.matmul %1, %0, %cst {dimension_numbers = #tpu.dot_dimension_numbers<[1], [0], [0], [1], [0, 0, 1, 1], [], []>} : vector<16x8xf32>, vector<8x256xf32>, vector<16x256xf32> -> vector<16x256xf32>
    %cst_3 = arith.constant 0.000000e+00 : f32
    %3 = vector.broadcast %cst_3 : f32 to vector<16x256xf32>
    %4 = arith.maximumf %2, %3 : vector<16x256xf32>
    %c16 = arith.constant 16 : index
    %c0_4 = arith.constant 0 : index
    %5 = vector.load %arg1[%c16, %c0_4] : memref<112x128xf32, #tpu.memory_space<vmem>>, vector<56x16xf32>
    %cst_5 = arith.constant dense<0.000000e+00> : vector<56x256xf32>
    %6 = tpu.matmul %5, %4, %cst_5 {dimension_numbers = #tpu.dot_dimension_numbers<[1], [0], [0], [1], [0, 0, 1, 1], [], []>} : vector<56x16xf32>, vector<16x256xf32>, vector<56x256xf32> -> vector<56x256xf32>
    %cst_6 = arith.constant 0.000000e+00 : f32
    %7 = vector.broadcast %cst_6 : f32 to vector<56x256xf32>
    %8 = arith.maximumf %6, %7 : vector<56x256xf32>
    %c72 = arith.constant 72 : index
    %c0_7 = arith.constant 0 : index
    %9 = vector.load %arg1[%c72, %c0_7] : memref<112x128xf32, #tpu.memory_space<vmem>>, vector<24x56xf32>
    %cst_8 = arith.constant dense<0.000000e+00> : vector<24x256xf32>
    %10 = tpu.matmul %9, %8, %cst_8 {dimension_numbers = #tpu.dot_dimension_numbers<[1], [0], [0], [1], [0, 0, 1, 1], [], []>} : vector<24x56xf32>, vector<56x256xf32>, vector<24x256xf32> -> vector<24x256xf32>
    %cst_9 = arith.constant 0.000000e+00 : f32
    %11 = vector.broadcast %cst_9 : f32 to vector<24x256xf32>
    %12 = arith.maximumf %10, %11 : vector<24x256xf32>
    %c96 = arith.constant 96 : index
    %c0_10 = arith.constant 0 : index
    %13 = vector.load %arg1[%c96, %c0_10] : memref<112x128xf32, #tpu.memory_space<vmem>>, vector<8x24xf32>
    %cst_11 = arith.constant dense<0.000000e+00> : vector<8x256xf32>
    %14 = tpu.matmul %13, %12, %cst_11 {dimension_numbers = #tpu.dot_dimension_numbers<[1], [0], [0], [1], [0, 0, 1, 1], [], []>} : vector<8x24xf32>, vector<24x256xf32>, vector<8x256xf32> -> vector<8x256xf32>
    %cst_12 = arith.constant 0.000000e+00 : f32
    %15 = vector.broadcast %cst_12 : f32 to vector<8x256xf32>
    %16 = arith.maximumf %14, %15 : vector<8x256xf32>
    %c104 = arith.constant 104 : index
    %c0_13 = arith.constant 0 : index
    %17 = vector.load %arg1[%c104, %c0_13] : memref<112x128xf32, #tpu.memory_space<vmem>>, vector<8x8xf32>
    %cst_14 = arith.constant dense<0.000000e+00> : vector<8x256xf32>
    %18 = tpu.matmul %17, %16, %cst_14 {dimension_numbers = #tpu.dot_dimension_numbers<[1], [0], [0], [1], [0, 0, 1, 1], [], []>} : vector<8x8xf32>, vector<8x256xf32>, vector<8x256xf32> -> vector<8x256xf32>
    %19 = vector.extract_strided_slice %18 {offsets = [0, 0], sizes = [1, 256], strides = [1, 1]} : vector<8x256xf32> to vector<1x256xf32>
    %c0_15 = arith.constant 0 : index
    %c0_16 = arith.constant 0 : index
    %20 = vector.load %arg3[%c0_15, %c0_16] : memref<1x256xf32, #tpu.memory_space<vmem>>, vector<1x256xf32>
    tpu.vector_store %arg3[%c0_15, %c0_16], %19 {strides = array<i32>} : memref<1x256xf32, #tpu.memory_space<vmem>>, vector<1x256xf32>,
    return
  }
  func.func @transform_0(%arg0: i32) -> (i32, i32) {
    %c0_i32 = arith.constant 0 : i32
    %c0_i32_0 = arith.constant 0 : i32
    %c0_i32_1 = arith.constant 0 : i32
    return %c0_i32, %c0_i32_0 : i32, i32
  }
  func.func @transform_1(%arg0: i32) -> (i32, i32) {
    %c0_i32 = arith.constant 0 : i32
    %c0_i32_0 = arith.constant 0 : i32
    return %c0_i32, %arg0 : i32, i32
  }
  func.func @transform_2(%arg0: i32) -> (i32, i32) {
    %c0_i32 = arith.constant 0 : i32
    %c0_i32_0 = arith.constant 0 : i32
    return %c0_i32, %arg0 : i32, i32
  }
}

</mosaic_0001>

<bundles_post_ra>
// kernel: neural_net_forward.2
= control target key start
LH: loop header
LB: loop body
LE: loop exit
PB: predicated region body
PF: predicated region fallthrough
CT: control target
= control target key end

     0   :  { %s1405_s0 = inlined_call_operand.hbm [shape: f32[112,128], index: 0, kind: input, shape index: {}]   ;;  %s1406_s1 = inlined_call_operand.hbm [shape: f32[6,300], index: 1, kind: input, shape index: {}]   ;;  %s1407_s2 = inlined_call_operand.<no memory space> [shape: f32[], index: 2, kind: input, shape index: {}]   ;;  %s1408_s3 = inlined_call_operand.<no memory space> [shape: f32[], index: 3, kind: input, shape index: {}]   ;;  %s1409_s4 = inlined_call_operand.<no memory space> [shape: s32[], index: 4, kind: input, shape index: {}]   ;;  %s1410_s5 = inlined_call_operand.vmem [shape: f32[8], index: 5, kind: input, shape index: {}]   ;;  %s1411_s6 = inlined_call_operand.vmem [shape: f32[8], index: 6, kind: input, shape index: {}]   ;;  %s1412_s7 = inlined_call_operand.vmem [shape: f32[1,512], index: 7, kind: output, shape index: {}]  }
   0x1   :  { %v1192_v0 = vstv %s1407_s2  ;;  %v13_v1 = vstv %s1408_s3  ;;  %v14_v2 = vstv %s1409_s4 }
   0x2   :  { %15 = vsyncpa [#allocation8], 0 }
   0x3   :  { %16 = vsyncpa [#allocation10], 0 }
   0x4   :  { %18 = vsyncpa [#allocation10 + $0x1], 0  ;;  %s1200_s30 = smov 0   ;;  %s1202_s8 = smov 0  }
   0x5   :  { %s1204_s9 = smov 0   ;;  %s1206_s10 = smov 0  }
   0x6 LB: > { %s1219_s2 = sadd.s32 4294967295, %s1141_s10   ;;  %s1222_s11 = sadd.s32 1, %s1141_s10   ;;  %s1141_s10 = sphi %s1206_s10, %s1428_s10   ;;  %s1137_s9 = sphi %s1204_s9, %s1427_s9   ;;  %s1133_s8 = sphi %s1202_s8, %s1426_s8   ;;  %s1129_s30 = sphi %s1200_s30, %s1425_s30  }
   0x7   : > { %s49_s12 = ssub.s32 %s1141_s10, %s1222_s11  ;;  %s52_s13 = sadd.s32 1, %s1137_s9 }
   0x8   : > { %p50_p0 = scmp.eq.s32.totalorder %s49_s12, 0  ;;  %p59_p1 = scmp.ne.s32.totalorder %s1137_s9, %s1133_s8 }
   0x9   : > { %p60_p2 = scmp.eq.s32.totalorder %s1141_s10, 0  ;;  %p65_p3 = scmp.ne.s32.totalorder %s1133_s8, %s1129_s30 }
   0xa   : > { %s1232_s14 = scalar_select %p50_p0, %s1137_s9, %s52_s13  }
   0xb   : > { %p1234_p4 = por %p60_p2, %p59_p1  ;;  %p1413_p5 = scmp.eq.s32.totalorder %s1219_s2, 0 }
   0xc   : > { %p940_p6 = scmp.ge.s32.totalorder %s1141_s10, 1  ;;  %p144_p7 = scmp.lt.s32.totalorder %s1141_s10, 3 }
   0xd   : > { %s1416_s15 = scalar_select %p1234_p4, 1, 0 }
   0xe   : > { %p1243_p8 = por %p1413_p5, %p65_p3  ;;  %p1247_p9 = pnand %p940_p6, %p144_p7 }
   0xf   : > { %s1143_s18 = smov [#allocation7]   ;;  %s1047_s23 = scalar_lea.hbm %s1405_s0, 1792 }
  0x10   : > { %s1417_s16 = scalar_select %p1243_p8, 1, 0 }
  0x11   : > { %s1418_s17 = scalar_select %p1247_p9, 1, 0 }
  0x12   : > { %s156_s19 = sshll.u32 %s1143_s18, 4  ;;  %p1004_p10 = pneg %p1247_p9  ;;  %s157_s19 = int_to_ptr.vmem [resolvable:$true] %s156_s19 }
  0x13   : > { %p1048_p12 = scmp.ne.s32.totalorder %s1405_s0, %s1047_s23  ;;  %p1054_p2 = scmp.lt.u32.totalorder %s1047_s23, %s1405_s0 }
  0x14   : > { %p1255_p11 = pnand %p1004_p10, %p1413_p5 }
  0x16   : > { %p1049_p13 = pneg %p1255_p11 }
  0x18   : > { %p1050_p0 = pnand %p1049_p13, %p1048_p12 }
  0x1a   : > { %p1051_p1 = pneg %p1050_p0 }
  0x1c   : > { %p1056_p3 = pnand %p1054_p2, %p1051_p1 }
  0x1e   : > { %1059 = shalt.err (!%p1056_p3)
}
  0x1f   : > { %s1060_s28 = scalar_lea.vmem %s157_s19, 1792  ;;  %p1068_p5 = scmp.lt.s32.totalorder %s157_s19, %s157_s19 }
  0x20   : > { %p1061_p6 = scmp.ne.s32.totalorder %s157_s19, %s1060_s28  ;;  %p1069_p8 = scmp.lt.s32.totalorder %s1060_s28, %s1060_s28 }
  0x22   : > { %p1063_p7 = pnand %p1061_p6, %p1049_p13  ;;  %p1070_p9 = por %p1069_p8, %p1068_p5 }
  0x24   : > { %p1064_p10 = pneg %p1063_p7 }
  0x26   : > { %p1071_p4 = pnand %p1070_p9, %p1064_p10 }
  0x28   : > { %1074 = shalt.err (!%p1071_p4)
}
  0x29   : > { %s1144_s29 = smov 128   ;;  %s1145_s30 = smov 8  }
  0x2a   : > { %1007 = dma.hbm_to_vmem [thread:$0]  (!%p1255_p11), %s1405_s0, 1792, %s157_s19, [#allocation8], %s1144_s29, %s1144_s29, %s1145_s30  }
  0x2b   : > { %p942_p12 = scmp.ge.s32.totalorder %s1141_s10, 2 }
  0x2c   : > { %p1420_p0 = scmp.ne.s32.totalorder (!%p942_p12), %s1416_s15, 0 }
  0x2d   : > { %166 = sbr.rel (%p942_p12) target bundleno = 86 (0x56), region = 20 }
  0x34   : > { %169 = sbr.rel (!%p1420_p0) target bundleno = 86 (0x56), region = 24  ;;  %s170_s18 = sand.u32 (%p1420_p0), 1, %s1137_s9  }
  0x35   : > { %s944_s21 = sshll.u32 (%p1420_p0), %s1141_s10, 1  ;;  %s943_s22 = sshll.u32 (%p1420_p0), %s170_s18, 4 }
  0x36   : > { %s176_s23 = ssub.s32 (%p1420_p0), 3, %s944_s21  ;;  %s1283_s25 = scalar_lea.sflag (%p1420_p0), [#allocation10], %s170_s18 }
  0x37   : > { %p177_p4 = scmp.lt.s32.totalorder (%p1420_p0), %s176_s23, 2  ;;  %s174_s19 = scalar_lea.vmem (%p1420_p0), [#allocation9], %s943_s22 }
  0x3b   : > { %s1430_s23 = smov (!%p177_p4, %s176_s23), 2 }
  0x3c   : > { %s1280_s24 = sshll.u32 %s1430_s23, 7 }
  0x3d   : > { %s181_s20 = ssub.s32 256, %s1280_s24 }
  0x3e   : > { %182 = vsyncadd %s1283_s25, %s181_s20  ;;  %p946_p5 = scmp.ne.s32.totalorder %s1280_s24, 0  ;;  %s974_s15 = sshll.u32 %s1141_s10, 8 }
  0x3f   : > { %s1291_s28 = scalar_lea.hbm %s1406_s1, %s974_s15  ;;  %s188_s29 = sshll.u32 %s174_s19, 4  ;;  %s189_s29 = int_to_ptr.vmem [resolvable:$true] %s188_s29 }
  0x40   : > { %s1075_s30 = scalar_lea.hbm %s1291_s28, %s1280_s24  ;;  %s1079_s10 = scalar_lea.hbm %s1406_s1, 384 }
  0x41   : > { %p1076_p8 = scmp.ne.s32.totalorder %s1291_s28, %s1075_s30  ;;  %p1080_p13 = scmp.lt.u32.totalorder %s1291_s28, %s1406_s1 }
  0x42   : > { %p1081_p1 = scmp.lt.u32.totalorder %s1079_s10, %s1075_s30  ;;  %p1083_p3 = scmp.lt.u32.totalorder %s1075_s30, %s1291_s28 }
  0x43   : > { %p1077_p9 = pnand %p1076_p8, %p946_p5 }
  0x44   : > { %p1082_p2 = por %p1081_p1, %p1080_p13 }
  0x45   : > { %p1078_p11 = pneg %p1077_p9 }
  0x46   : > { %p1084_p6 = por %p1083_p3, %p1082_p2 }
  0x48   : > { %p1085_p7 = pnand %p1084_p6, %p1078_p11 }
  0x4a   : > { %1088 = shalt.err (!%p1085_p7)
}
  0x4b   : > { %s1089_s22 = scalar_lea.vmem %s189_s29, %s1280_s24  ;;  %s1146_s23 = smov [#allocation9]  }
  0x4c   : > { %p1090_p10 = scmp.ne.s32.totalorder %s189_s29, %s1089_s22  ;;  %s1093_s20 = sshll.u32 %s1146_s23, 4  ;;  %s1094_s20 = int_to_ptr.vmem [resolvable:$false] %s1093_s20 }
  0x4d   : > { %s1095_s19 = scalar_lea.vmem %s1094_s20, 512  ;;  %p1096_p4 = scmp.lt.s32.totalorder %s189_s29, %s1094_s20 }
  0x4e   : > { %p1091_p12 = pnand %p1090_p10, %p946_p5  ;;  %p1097_p8 = scmp.lt.s32.totalorder %s1095_s19, %s1089_s22 }
  0x50   : > { %p1092_p0 = pneg %p1091_p12  ;;  %p1098_p9 = por %p1097_p8, %p1096_p4 }
  0x52   : > { %p1099_p1 = pnand %p1098_p9, %p1092_p0 }
  0x54   : > { %1102 = shalt.err (!%p1099_p1)
}
  0x55   : > { %191 = dma.hbm_to_vmem [thread:$0]  (%p946_p5), %s1291_s28, %s1280_s24, %s189_s29, %s1283_s25  }
  0x56 PF: > { %p1421_p11 = scmp.ne.s32.totalorder %s1418_s17, 0 }
  0x57   : > { %p1422_p13 = scmp.eq.s32.totalorder (!%p1421_p11), %s1219_s2, 0 }
  0x58   : > { %203 = sbr.rel (%p1421_p11) target bundleno = 1357 (0x54d), region = 36 }
  0x5f   : > { %1120 = dma.done.wait (%p1422_p13), [#allocation8], 1792   ;;  %p1423_p2 = pmov %p1422_p13 }
  0x60   : > { %s209_s15 = sand.u32 1, %s1133_s8   ;;  %p1424_p3 = scmp.ne.s32.totalorder %s1417_s16, 0 }
  0x61   : > { %1122 = vsyncadd (%p1423_p2), [#allocation8], 4294965504  ;;  %s952_s26 = sshll.u32 %s209_s15, 4  ;;  %s210_s27 = scalar_lea.sflag [#allocation10], %s209_s15 }
  0x62   : > { %s213_s30 = scalar_lea.vmem [#allocation9], %s952_s26 }
  0x63   : > { %1124 = dma.done.wait (%p1424_p3), %s210_s27, 256  }
  0x64   : > { %1126 = vsyncadd (%p1424_p3), %s210_s27, 4294967040  ;;  %v1147_v3 = vmov 0.0   ;;  %v274_v4 = vld [vmem:[%s1411_s6] ss:$0 sm:$0xff]  ;;  %s1334_s29 = sshll.u32 %s1219_s2, 1  ;;  %s975_s12 = sshll.u32 %s1219_s2, 8  ;;  %v258_v6 = vlaneseq }
  0x65   : > { %420 = vmatprep.mubr.f32.mxu0 %v1147_v3  ;;  %530 = vmatprep.mubr.f32.mxu1 %v1147_v3  ;;  %v270_v5 = vld [vmem:[%s1410_s5] ss:$0 sm:$0xff]  ;;  %s303_s16 = sadd.s32 1, %s1334_s29  ;;  %s254_s13 = ssub.s32 2, %s1334_s29  ;;  %v266_v11 = vstv %s975_s12  ;;  %v956_v13 = vld [vmem:[%s213_s30 + $0x8] sm:$0x3f] }
  0x66   : > { %276 = vbcast.lane.b32.xlu0 %v274_v4, 256  ;;  %s304_s10 = ssub.s32 2, %s303_s16  ;;  %s977_s18 = sadd.s32 128, %s975_s12  ;;  %v255_v7 = vstv %s254_s13  ;;  %v265_v9 = vand.u32 127, %v258_v6  ;;  %v1341_v10 = vshrl.u32 %v258_v6, 7  ;;  %v347_v31 = vld [vmem:[#allocation7] sm:$0xff] }
  0x67   : > { %v305_v8 = vstv %s304_s10  ;;  %v317_v12 = vstv %s977_s18  ;;  %vm256_vm0 = vcmp.lt.s32.totalorder %v255_v7, 0  ;;  %v253_v14 = vld [vmem:[%s213_s30] sm:$0x3f]  ;;  %vm349_vm6 = vcmask 64512   ;;  %v348_v32 = vld [vmem:[#allocation7 + $0x8] sm:$0xff]  ;;  %v438_v44 = vld [vmem:[#allocation7 + $0x18] sm:$0xff] }
  0x68   : > { %vm306_vm1 = vcmp.lt.s32.totalorder %v305_v8, 0  ;;  %v267_v15 = vadd.s32 %v266_v11, %v265_v9  ;;  %v318_v16 = vadd.s32 %v317_v12, %v265_v9  ;;  %vm261_vm2 = vcmp.lt.s32.totalorder %v1341_v10, 6  ;;  %v437_v43 = vld [vmem:[#allocation7 + $0x10] sm:$0xff]  ;;  %v439_v45 = vld [vmem:[#allocation7 + $0x20] sm:$0xff]  ;;  %v440_v46 = vld [vmem:[#allocation7 + $0x28] sm:$0xff]  ;;  %p245_p5 = scmp.lt.s32.totalorder %s1334_s29, 3 }
  0x69   : > { %v307_v17 = vsel %vm306_vm1, %v1192_v0, %v956_v13  ;;  %v257_v18 = vsel %vm256_vm0, %v1192_v0, %v253_v14  ;;  %vm284_vm5 = vcmp.lt.s32.totalorder %v1341_v10, %v14_v2  ;;  %vm444_vm7 = vcmask 130048   ;;  %v441_v47 = vld [vmem:[#allocation7 + $0x30] sm:$0xff]  ;;  %v442_v48 = vld [vmem:[#allocation7 + $0x38] sm:$0xff]  ;;  %v443_v49 = vld [vmem:[#allocation7 + $0x40] sm:$0xff] }
  0x6a   : > { %272 = vbcast.lane.b32.xlu0 %v270_v5, 256  ;;  %vm268_vm3 = vcmp.lt.s32.totalorder %v267_v15, 300  ;;  %v312_v19 = vsel %vm261_vm2, %v307_v17, %v1192_v0  ;;  %vm319_vm4 = vcmp.lt.s32.totalorder %v318_v16, 300  ;;  %v262_v20 = vsel %vm261_vm2, %v257_v18, %v1192_v0  ;;  %s1432_s29 = smov (!%p245_p5, %s1334_s29), 3 }
  0x6b   : > { %v320_v21 = vsel %vm319_vm4, %v312_v19, %v1192_v0  ;;  %v269_v22 = vsel %vm268_vm3, %v262_v20, %v1192_v0  ;;  %vm590_vm8 = vcmask 457728   ;;  %vm690_vm9 = vcmask 195584   ;;  %s247_s27 = scalar_lea.vmem %s1412_s7, %s1432_s29 }
  0x6c   : > { %v332_v23 = vsel %vm284_vm5, %v320_v21, %v13_v1  ;;  %v289_v25 = vsel %vm284_vm5, %v269_v22, %v13_v1  ;;  %vm862_vm10 = vcmp.lt.s32.totalorder %v258_v6, 256 }
  0xd8   : > { %v277_v24 = vpop.permute.xlu0 %276 }
  0xd9   : > { %v293_v26 = vmax.f32 %v289_v25, %v277_v24  ;;  %v336_v27 = vmax.f32 %v332_v23, %v277_v24 }
  0xdc   : > { %v273_v28 = vpop.permute.xlu0 %272 }
  0xdd   : > { %v297_v29 = vmax.f32 %v293_v26, %v273_v28  ;;  %v340_v30 = vmax.f32 %v336_v27, %v273_v28  ;;  %v587_v26 = vld [vmem:[#allocation7 + $0x48] sm:$0xff]  ;;  %v588_v27 = vld [vmem:[#allocation7 + $0x50] sm:$0xff]  ;;  %v589_v28 = vld [vmem:[#allocation7 + $0x58] sm:$0xff] }
  0xdf   : > { %356 = vmatprep.subr.mxu0 %v340_v30 }
  0xe0   : > { %357 = vmatpush1.msra.mxu0 %v297_v29 }
  0xe1   : > { %958 = vmatmul.mubr.msk.f32.vlgmr.msra.gmra.mrb[0].mxu0 %vm349_vm6, %v347_v31 }
  0xe2   : > { %426 = vmatprep.mubr.f32.mxu0 %v1147_v3 }
  0xe5   : > { %959 = vmatmul.mubr.msk.f32.gmra.mrb[2].mxu0 %vm349_vm6, %v348_v32 }
  0xe6   : > { %664 = vmatprep.mubr.f32.mxu0 %v1147_v3 }
 0x1b4   : > { %v422_v33 = vpop.f32.mrb[0].mxu0 }
 0x1b5   : > { %v424_v34 = vpop.f32.mrb[1].mxu0  ;;  %v433_v36 = vmax.f32 %v422_v33, 0.0 }
 0x1b6   : > { %v434_v39 = vmax.f32 %v424_v34, 0.0 }
 0x1b8   : > { %v428_v35 = vpop.f32.mrb[2].mxu0 }
 0x1b9   : > { %v435_v37 = vmax.f32 %v428_v35, 0.0  ;;  %v430_v38 = vpop.f32.mrb[3].mxu0 }
 0x1ba   : > { %v436_v40 = vmax.f32 %v430_v38, 0.0 }
 0x1bb   : > { %v981_v41 = vpack.c.bf16 %v435_v37, %v433_v36 }
 0x1bc   : > { %v979_v42 = vpack.c.bf16 %v436_v40, %v434_v39 }
 0x1be   : > { %980 = vmatprep.subr.bf16.mxu1 %v979_v42 }
 0x1bf   : > { %982 = vmatpush1.bf16.msra.mxu1 %v981_v41 }
 0x1c2   : > { %960 = vmatmul.mubr.msk.f32.vlgmr.msra.gmra.mrb[0].mxu1 %vm444_vm7, %v437_v43  ;;  %v689_v43 = vld [vmem:[#allocation7 + $0x60] sm:$0xff] }
 0x1c3   : > { %536 = vmatprep.mubr.f32.mxu1 %v1147_v3 }
 0x1c6   : > { %961 = vmatmul.mubr.msk.f32.gmra.mrb[2].mxu1 %vm444_vm7, %v438_v44 }
 0x1c7   : > { %542 = vmatprep.mubr.f32.mxu1 %v1147_v3 }
 0x1ca   : > { %962 = vmatmul.mubr.msk.f32.gmra.mrb[4].mxu1 %vm444_vm7, %v439_v45 }
 0x1cb   : > { %548 = vmatprep.mubr.f32.mxu1 %v1147_v3 }
 0x1ce   : > { %963 = vmatmul.mubr.msk.f32.gmra.mrb[6].mxu1 %vm444_vm7, %v440_v46 }
 0x1cf   : > { %554 = vmatprep.mubr.f32.mxu1 %v1147_v3 }
 0x1d2   : > { %964 = vmatmul.mubr.msk.f32.gmra.mrb[8].mxu1 %vm444_vm7, %v441_v47 }
 0x1d3   : > { %560 = vmatprep.mubr.f32.mxu1 %v1147_v3 }
 0x1d6   : > { %965 = vmatmul.mubr.msk.f32.gmra.mrb[10].mxu1 %vm444_vm7, %v442_v48  ;;  %v767_v48 = vld [vmem:[#allocation7 + $0x68] sm:$0xff] }
 0x1d7   : > { %566 = vmatprep.mubr.f32.mxu1 %v1147_v3 }
 0x1da   : > { %966 = vmatmul.mubr.msk.f32.gmra.mrb[12].mxu1 %vm444_vm7, %v443_v49  ;;  %v1148_v49 = vmov 1966171168  }
 0x295   : > { %v532_v50 = vpop.f32.mrb[0].mxu1 }
 0x296   : > { %v534_v51 = vpop.f32.mrb[1].mxu1  ;;  %v573_v53 = vmax.f32 %v532_v50, 0.0  ;;  %v846_v50 = vunpack.c.l.s4 %v1148_v49 }
 0x297   : > { %v574_v56 = vmax.f32 %v534_v51, 0.0 }
 0x298   : > { %v847_v51 = vunpack.c.0.s8 %v846_v50 }
 0x299   : > { %v538_v52 = vpop.f32.mrb[2].mxu1 }
 0x29a   : > { %v575_v54 = vmax.f32 %v538_v52, 0.0  ;;  %v540_v55 = vpop.f32.mrb[3].mxu1 }
 0x29b   : > { %v576_v57 = vmax.f32 %v540_v55, 0.0 }
 0x29c   : > { %v985_v58 = vpack.c.bf16 %v575_v54, %v573_v53  ;;  %v850_v53 = vsub.s32 %v847_v51, %v1341_v10 }
 0x29d   : > { %v983_v59 = vpack.c.bf16 %v576_v57, %v574_v56  ;;  %v544_v60 = vpop.f32.mrb[4].mxu1 }
 0x29e   : > { %v546_v61 = vpop.f32.mrb[5].mxu1  ;;  %v577_v63 = vmax.f32 %v544_v60, 0.0 }
 0x29f   : > { %984 = vmatprep.subr.bf16.mxu0 %v983_v59  ;;  %v578_v7 = vmax.f32 %v546_v61, 0.0 }
 0x2a0   : > { %986 = vmatpush1.bf16.msra.mxu0 %v985_v58 }
 0x2a1   : > { %v550_v62 = vpop.f32.mrb[6].mxu1 }
 0x2a2   : > { %v579_v4 = vmax.f32 %v550_v62, 0.0  ;;  %v552_v5 = vpop.f32.mrb[7].mxu1 }
 0x2a3   : > { %v580_v8 = vmax.f32 %v552_v5, 0.0 }
 0x2a4   : > { %v989_v9 = vpack.c.bf16 %v579_v4, %v577_v63 }
 0x2a5   : > { %v987_v11 = vpack.c.bf16 %v580_v8, %v578_v7  ;;  %v556_v12 = vpop.f32.mrb[8].mxu1 }
 0x2a6   : > { %v558_v13 = vpop.f32.mrb[9].mxu1  ;;  %v581_v15 = vmax.f32 %v556_v12, 0.0 }
 0x2a7   : > { %988 = vmatprep.subr.bf16.mxu0 %v987_v11  ;;  %v582_v18 = vmax.f32 %v558_v13, 0.0 }
 0x2a8   : > { %990 = vmatpush1.bf16.msra.mxu0 %v989_v9 }
 0x2a9   : > { %v562_v14 = vpop.f32.mrb[10].mxu1 }
 0x2aa   : > { %v583_v16 = vmax.f32 %v562_v14, 0.0  ;;  %v564_v17 = vpop.f32.mrb[11].mxu1 }
 0x2ab   : > { %v584_v19 = vmax.f32 %v564_v17, 0.0 }
 0x2ac   : > { %v993_v20 = vpack.c.bf16 %v583_v16, %v581_v15 }
 0x2ad   : > { %v991_v21 = vpack.c.bf16 %v584_v19, %v582_v18  ;;  %v568_v22 = vpop.f32.mrb[12].mxu1 }
 0x2ae   : > { %v570_v23 = vpop.f32.mrb[13].mxu1  ;;  %v585_v25 = vmax.f32 %v568_v22, 0.0 }
 0x2af   : > { %v586_v24 = vmax.f32 %v570_v23, 0.0  ;;  %992 = vmatprep.subr.bf16.mxu0 %v991_v21 }
 0x2b0   : > { %994 = vmatpush1.bf16.msra.mxu0 %v993_v20 }
 0x2b1   : > { %612 = vmatprep.subr.mxu0 %v586_v24 }
 0x2b4   : > { %613 = vmatpush1.msra.mxu0 %v585_v25 }
 0x2b5   : > { %967 = vmatmul.mubr.msk.f32.vlgmr.msra.gmra.mrb[4].mxu0 %vm590_vm8, %v587_v26 }
 0x2b6   : > { %670 = vmatprep.mubr.f32.mxu0 %v1147_v3 }
 0x2b9   : > { %968 = vmatmul.mubr.msk.f32.gmra.mrb[6].mxu0 %vm590_vm8, %v588_v27 }
 0x2ba   : > { %676 = vmatprep.mubr.f32.mxu0 %v1147_v3 }
 0x2bd   : > { %969 = vmatmul.mubr.msk.f32.gmra.mrb[8].mxu0 %vm590_vm8, %v589_v28 }
 0x2be   : > { %758 = vmatprep.mubr.f32.mxu0 %v1147_v3 }
 0x388   : > { %v666_v29 = vpop.f32.mrb[4].mxu0 }
 0x389   : > { %v668_v30 = vpop.f32.mrb[5].mxu0  ;;  %v683_v32 = vmax.f32 %v666_v29, 0.0 }
 0x38a   : > { %v684_v35 = vmax.f32 %v668_v30, 0.0 }
 0x38c   : > { %v672_v31 = vpop.f32.mrb[6].mxu0 }
 0x38d   : > { %v685_v33 = vmax.f32 %v672_v31, 0.0  ;;  %v674_v34 = vpop.f32.mrb[7].mxu0 }
 0x38e   : > { %v686_v36 = vmax.f32 %v674_v34, 0.0 }
 0x38f   : > { %v997_v37 = vpack.c.bf16 %v685_v33, %v683_v32 }
 0x390   : > { %v995_v38 = vpack.c.bf16 %v686_v36, %v684_v35  ;;  %v678_v39 = vpop.f32.mrb[8].mxu0 }
 0x391   : > { %v680_v40 = vpop.f32.mrb[9].mxu0  ;;  %v687_v42 = vmax.f32 %v678_v39, 0.0 }
 0x392   : > { %996 = vmatprep.subr.bf16.mxu0 %v995_v38  ;;  %v688_v41 = vmax.f32 %v680_v40, 0.0 }
 0x393   : > { %998 = vmatpush1.bf16.msra.mxu0 %v997_v37 }
 0x394   : > { %698 = vmatprep.subr.mxu0 %v688_v41 }
 0x397   : > { %699 = vmatpush1.msra.mxu0 %v687_v42 }
 0x398   : > { %970 = vmatmul.mubr.msk.f32.vlgmr.msra.gmra.mrb[10].mxu0 %vm690_vm9, %v689_v43 }
 0x399   : > { %835 = vmatprep.mubr.f32.mxu0 %v1147_v3 }
 0x46b   : > { %v760_v44 = vpop.f32.mrb[10].mxu0 }
 0x46c   : > { %v762_v45 = vpop.f32.mrb[11].mxu0  ;;  %v765_v47 = vmax.f32 %v760_v44, 0.0 }
 0x46d   : > { %v766_v46 = vmax.f32 %v762_v45, 0.0 }
 0x46f   : > { %771 = vmatprep.subr.mxu0 %v766_v46 }
 0x470   : > { %772 = vmatpush1.msra.mxu0 %v765_v47 }
 0x471   : > { %971 = vmatmul.mubr.msk.f32.vlgmr.msra.gmra.mrb[12].mxu0 %vm349_vm6, %v767_v48 }
 0x544   : > { %v837_v52 = vpop.f32.mrb[12].mxu0 }
 0x545   : > { %v839_v54 = vpop.f32.mrb[13].mxu0 }
 0x546   : > { %v844_v55 = vcombine.low %v837_v52, %v839_v54 }
 0x548   : > { %v851_v3 = vrot.slane %v844_v55, %v850_v53 }
 0x54a   : > { %v858_v56 = vrot.slane %v851_v3, %v850_v53 }
 0x54c   : > { %864 = vst.msk [vmem:[%s247_s27] sm:$0x3] %vm862_vm10, %v858_v56 }
 0x54d PF: > { %p21_p6 = scmp.ge.s32.totalorder %s1222_s11, 4   ;;  %s1425_s30 = smov %s1133_s8 }
 0x54e   : > { %s1426_s8 = smov %s1137_s9  ;;  %s1427_s9 = smov %s1232_s14 }
 0x54f   : > { %s1428_s10 = smov %s1222_s11  ;;  %23 = sbr.rel (!%p21_p6) target bundleno = 6 (0x6), region = 83 }
 0x556   :  { %885 = vsyncpa [#allocation8], 1 }
 0x557   :  { %887 = vsyncpa [#allocation8 + $0x1], 1 }
 0x558   :  { %888 = vsyncpa [#allocation10], 1 }
 0x559   :  { %890 = vsyncpa [#allocation10 + $0x1], 1 }

</bundles_post_ra>
